<compile_context>
chip_gen: v5e
topology: v5e:2x2
jax: 0.10.0
libtpu: 0.0.40
codegen_flags: <defaults>
</compile_context>

<pallas_src>
import jax
import jax.numpy as jnp
from jax.experimental import pallas as pl
from jax.experimental.pallas import tpu as pltpu


def _harmonic_kernel(x_ref, sel_ref, freq_ref, out_ref):
    """One row-tile of the harmonic embedding.

    x_ref:    (TN, D)       f32   VMEM
    sel_ref:  (D, D*H)      bf16  VMEM   0/1 selection matrix, sel[d, d*H+h] = 1
    freq_ref: (1, D*H)      f32   VMEM   freq_full[0, d*H+h] = omega0 * 2**h
    out_ref:  (TN, 2*D*H)   f32 / bf16   VMEM
    """
    x = x_ref[...]            # (TN, D)
    sel = sel_ref[...]        # (D, D*H) 0/1 in bf16 (exact)

    # Exact 3-term bf16 split of x: x == x_hi + x_mid + x_lo bit-exactly.
    x_hi = x.astype(jnp.bfloat16)
    r1 = x - x_hi.astype(jnp.float32)
    x_mid = r1.astype(jnp.bfloat16)
    x_lo = (r1 - x_mid.astype(jnp.float32)).astype(jnp.bfloat16)

    def replicate(chunk):
        # (TN, D) @ (D, D*H) 0/1 matrix on the MXU: exact per-chunk replication.
        return jnp.dot(chunk, sel, preferred_element_type=jnp.float32)

    # f32 sums of the non-overlapping chunks reconstruct x exactly.
    x_rep = (replicate(x_hi) + replicate(x_mid)) + replicate(x_lo)   # (TN, D*H)

    # Exact f32 multiply — identical to the reference's x[..., None] * frequencies.
    e = x_rep * freq_ref[...]

    # Single full-block, lane-dense store of [sin | cos] (no misaligned sub-slab
    # stores at lane offset D*H).
    out_ref[...] = jnp.concatenate(
        [jnp.sin(e), jnp.cos(e)], axis=-1).astype(out_ref.dtype)


def _vmem_bytes(tn, dim, dh, out_feat, out_bytes):
    """Conservative per-step VMEM footprint (pipeline blocks + live temporaries)."""
    pipeline = 2 * (tn * out_feat * out_bytes       # out block, double-buffered
                    + tn * dim * 4)                  # x block, double-buffered
    pipeline += 2 * (dim * dh * 2 + dh * 4)          # sel (bf16) + freq blocks
    temps = 4 * tn * dh * 4                          # x_rep, e, sin, cos (f32)
    temps += tn * out_feat * 4                       # concatenated slab before cast/store
    return pipeline + temps + (2 << 20)              # compiler scratch slop


def harmonic_embedding(x, n_harmonic_functions=60, omega0=0.1, *,
                       row_tile=8192, out_dtype=jnp.float32):
    """JAX/Pallas equivalent of HarmonicEmbedding.forward.

    x: float32 array of shape [..., dim]
    returns: array of shape [..., n_harmonic_functions * dim * 2] (out_dtype)
    row_tile: rows per grid step (auto-shrunk to fit the VMEM budget).
    out_dtype: jnp.float32 (default, matches the PyTorch module) or
               jnp.bfloat16 (opt-in, halves HBM write traffic on v5e).
    """
    x = jnp.asarray(x, jnp.float32)
    *lead, dim = x.shape
    H = n_harmonic_functions
    dh = dim * H
    out_feat = 2 * dh
    out_bytes = jnp.finfo(out_dtype).bits // 8

    # Same expression as the PyTorch register_buffer (bit-identical values),
    # pre-tiled to the replicated (1, D*H) layout used by the kernel.
    freqs = omega0 * (2.0 ** jnp.arange(H, dtype=jnp.float32))           # (H,)
    freq_full = jnp.tile(freqs, dim).reshape(1, dh)                       # (1, D*H)
    # 0/1 selection matrix: sel[d, d*H + h] = 1  (0.0 / 1.0 are exact in bf16).
    sel = jnp.repeat(jnp.eye(dim, dtype=jnp.float32), H, axis=1).astype(jnp.bfloat16)

    n_rows = 1
    for s in lead:
        n_rows *= s
    x2d = x.reshape(n_rows, dim)

    # Generation-aware VMEM budget (per TensorCore: 128 MiB v5e/v6e, 64 MiB v7x).
    try:
        phys_vmem = getattr(pltpu.get_tpu_info(), "vmem_capacity_bytes", 64 << 20)
    except Exception:
        phys_vmem = 64 << 20
    phys_vmem = phys_vmem or (64 << 20)
    budget = max(int(0.75 * phys_vmem), 32 << 20)

    # Row tile: as big as the budget allows (amortizes ~0.35us/grid-step
    # overhead); multiple of 16 sublanes (covers f32 and bf16 output tiles).
    tn = max(16, min(row_tile, n_rows))
    tn = -(-tn // 16) * 16
    while tn > 64 and _vmem_bytes(tn, dim, dh, out_feat, out_bytes) > budget:
        tn = max(64, -(-(tn // 2) // 16) * 16)

    vmem_limit = min(max(_vmem_bytes(tn, dim, dh, out_feat, out_bytes), 16 << 20),
                     budget)

    out2d = pl.pallas_call(
        _harmonic_kernel,
        out_shape=jax.ShapeDtypeStruct((n_rows, out_feat), out_dtype),
        grid_spec=pltpu.PrefetchScalarGridSpec(
            num_scalar_prefetch=0,
            grid=(pl.cdiv(n_rows, tn),),          # ragged grid: no pad, no slice copy
            in_specs=[
                pl.BlockSpec((tn, dim), lambda i: (i, 0)),
                pl.BlockSpec((dim, dh), lambda i: (0, 0)),
                pl.BlockSpec((1, dh), lambda i: (0, 0)),
            ],
            out_specs=pl.BlockSpec((tn, out_feat), lambda i: (i, 0)),
        ),
        compiler_params=pltpu.CompilerParams(
            dimension_semantics=("parallel",),
            vmem_limit_bytes=vmem_limit,
        ),
    )(x2d, sel, freq_full)

    return out2d.reshape(*lead, out_feat)


def _reference(x, n_harmonic_functions=60, omega0=0.1):
    frequencies = omega0 * (2.0 ** jnp.arange(n_harmonic_functions, dtype=jnp.float32))
    embed = (x[..., None] * frequencies).reshape(*x.shape[:-1], -1)
    return jnp.concatenate((jnp.sin(embed), jnp.cos(embed)), axis=-1)


if __name__ == "__main__":
    key = jax.random.PRNGKey(0)
    k1, k2 = jax.random.split(key)

    # Small NeRF-style batch of 3-D points (single tile).
    x_small = jax.random.normal(k1, (2, 8, 3), dtype=jnp.float32)
    out_small = jax.block_until_ready(harmonic_embedding(x_small))
    ref_small = _reference(x_small)
    assert out_small.shape == (2, 8, 2 * 3 * 60), out_small.shape
    assert jnp.allclose(out_small, ref_small, atol=1e-5, rtol=1e-5), \
        float(jnp.max(jnp.abs(out_small - ref_small)))

    # Opt-in bf16 output path (v5e HBM-bound mode); looser tolerance from the cast.
    out_small_bf16 = jax.block_until_ready(
        harmonic_embedding(x_small, out_dtype=jnp.bfloat16))
    assert out_small_bf16.dtype == jnp.bfloat16
    assert jnp.allclose(out_small_bf16.astype(jnp.float32), ref_small,
                        atol=2e-2, rtol=0.0)

    # Larger ray batch exercising multiple row tiles + a ragged trailing block
    # (4000 rows with row_tile=512 -> 8 grid steps, last one partial).
    x_big = jax.random.normal(k2, (4, 1000, 3), dtype=jnp.float32)
    out_big = jax.block_until_ready(harmonic_embedding(x_big, row_tile=512))
    ref_big = _reference(x_big)
    assert out_big.shape == (4, 1000, 2 * 3 * 60), out_big.shape
    assert jnp.allclose(out_big, ref_big, atol=1e-5, rtol=1e-5), \
        float(jnp.max(jnp.abs(out_big - ref_big)))

    print("KERNEL_OK")
</pallas_src>

<mosaic_0001>
module attributes {stable_mosaic.version = 11 : i64} {
  func.func @_harmonic_kernel(%arg0: i32, %arg1: memref<16x3xf32, #tpu.memory_space<vmem>>, %arg2: memref<3x180xbf16, #tpu.memory_space<vmem>>, %arg3: memref<1x180xf32, #tpu.memory_space<vmem>>, %arg4: memref<16x360xf32, #tpu.memory_space<vmem>>) attributes {dimension_semantics = [#tpu.dimension_semantics<parallel>], iteration_bounds = array<i64: 1>, scalar_prefetch = 0 : i64, scratch_operands = 0 : i64, tpu.core_type = #tpu.core_type<tc>, window_params = [{transform_indices = @transform_0, window_bounds = array<i64: 16, 3>}, {pipeline_mode = #tpu.pipeline_mode<synchronous>, transform_indices = @transform_1, window_bounds = array<i64: 3, 180>}, {pipeline_mode = #tpu.pipeline_mode<synchronous>, transform_indices = @transform_2, window_bounds = array<i64: 1, 180>}, {transform_indices = @transform_3, window_bounds = array<i64: 16, 360>}]} {
    %c0 = arith.constant 0 : index
    %c0_0 = arith.constant 0 : index
    %0 = vector.load %arg1[%c0, %c0_0] : memref<16x3xf32, #tpu.memory_space<vmem>>, vector<16x3xf32>
    %c0_1 = arith.constant 0 : index
    %c0_2 = arith.constant 0 : index
    %1 = vector.load %arg2[%c0_1, %c0_2] : memref<3x180xbf16, #tpu.memory_space<vmem>>, vector<3x180xbf16>
    %2 = arith.truncf %0 : vector<16x3xf32> to vector<16x3xbf16>
    %3 = arith.extf %2 : vector<16x3xbf16> to vector<16x3xf32>
    %4 = arith.subf %0, %3 : vector<16x3xf32>
    %5 = arith.truncf %4 : vector<16x3xf32> to vector<16x3xbf16>
    %6 = arith.extf %5 : vector<16x3xbf16> to vector<16x3xf32>
    %7 = arith.subf %4, %6 : vector<16x3xf32>
    %8 = arith.truncf %7 : vector<16x3xf32> to vector<16x3xbf16>
    %cst = arith.constant dense<0.000000e+00> : vector<16x180xf32>
    %9 = tpu.matmul %2, %1, %cst {dimension_numbers = #tpu.dot_dimension_numbers<[1], [0], [0], [1], [0, 0, 1, 1], [], []>} : vector<16x3xbf16>, vector<3x180xbf16>, vector<16x180xf32> -> vector<16x180xf32>
    %cst_3 = arith.constant dense<0.000000e+00> : vector<16x180xf32>
    %10 = tpu.matmul %5, %1, %cst_3 {dimension_numbers = #tpu.dot_dimension_numbers<[1], [0], [0], [1], [0, 0, 1, 1], [], []>} : vector<16x3xbf16>, vector<3x180xbf16>, vector<16x180xf32> -> vector<16x180xf32>
    %11 = arith.addf %9, %10 : vector<16x180xf32>
    %cst_4 = arith.constant dense<0.000000e+00> : vector<16x180xf32>
    %12 = tpu.matmul %8, %1, %cst_4 {dimension_numbers = #tpu.dot_dimension_numbers<[1], [0], [0], [1], [0, 0, 1, 1], [], []>} : vector<16x3xbf16>, vector<3x180xbf16>, vector<16x180xf32> -> vector<16x180xf32>
    %13 = arith.addf %11, %12 : vector<16x180xf32>
    %c0_5 = arith.constant 0 : index
    %c0_6 = arith.constant 0 : index
    %14 = vector.load %arg3[%c0_5, %c0_6] : memref<1x180xf32, #tpu.memory_space<vmem>>, vector<1x180xf32>
    %15 = vector.broadcast %14 : vector<1x180xf32> to vector<16x180xf32>
    %16 = arith.mulf %13, %15 : vector<16x180xf32>
    %17 = math.sin %16 : vector<16x180xf32>
    %18 = math.cos %16 : vector<16x180xf32>
    %19 = tpu.concatenate %17, %18 in 1 : vector<16x180xf32>, vector<16x180xf32> -> vector<16x360xf32>
    %c0_7 = arith.constant 0 : index
    %c0_8 = arith.constant 0 : index
    %20 = vector.load %arg4[%c0_7, %c0_8] : memref<16x360xf32, #tpu.memory_space<vmem>>, vector<16x360xf32>
    tpu.vector_store %arg4[%c0_7, %c0_8], %19 {strides = array<i32>} : memref<16x360xf32, #tpu.memory_space<vmem>>, vector<16x360xf32>,
    return
  }
  func.func @transform_0(%arg0: i32) -> (i32, i32) {
    %c0_i32 = arith.constant 0 : i32
    %c0_i32_0 = arith.constant 0 : i32
    return %arg0, %c0_i32 : i32, i32
  }
  func.func @transform_1(%arg0: i32) -> (i32, i32) {
    %c0_i32 = arith.constant 0 : i32
    %c0_i32_0 = arith.constant 0 : i32
    %c0_i32_1 = arith.constant 0 : i32
    return %c0_i32, %c0_i32_0 : i32, i32
  }
  func.func @transform_2(%arg0: i32) -> (i32, i32) {
    %c0_i32 = arith.constant 0 : i32
    %c0_i32_0 = arith.constant 0 : i32
    %c0_i32_1 = arith.constant 0 : i32
    return %c0_i32, %c0_i32_0 : i32, i32
  }
  func.func @transform_3(%arg0: i32) -> (i32, i32) {
    %c0_i32 = arith.constant 0 : i32
    %c0_i32_0 = arith.constant 0 : i32
    return %arg0, %c0_i32 : i32, i32
  }
}

</mosaic_0001>

<bundles_post_ra>
// kernel: tpu_custom_call.1
= control target key start
LH: loop header
LB: loop body
LE: loop exit
PB: predicated region body
PF: predicated region fallthrough
CT: control target
= control target key end

     0   :  { %vm45_vm0 = vcmask 1040384   ;;  %s2044_s0 = inlined_call_operand.vmem [shape: f32[16,3], index: 0, kind: input, shape index: {}]   ;;  %s2045_s1 = inlined_call_operand.vmem [shape: bf16[3,180], index: 1, kind: input, shape index: {}]   ;;  %s2046_s2 = inlined_call_operand.vmem [shape: f32[1,180], index: 2, kind: input, shape index: {}]   ;;  %s2047_s3 = inlined_call_operand.hbm [shape: f32[16,360], index: 3, kind: output, shape index: {}]  }
   0x1   :  { %v18_v0 = vld [vmem:[%s2045_s1] sm:$0xf]  ;;  %v17_v2 = vld [vmem:[%s2044_s0 + $0x8] sm:$0xff] }
   0x2   :  { %v16_v1 = vld [vmem:[%s2044_s0] sm:$0xff]  ;;  %38 = vst [vmem:[#allocation1] ss:$4 sm:$0xff] %v18_v0  ;;  %v20_v4 = vpack.c.bf16 %v17_v2, %v17_v2 }
   0x3   :  { %v19_v3 = vpack.c.bf16 %v16_v1, %v16_v1 }
   0x4   :  { %8 = vsyncpa [#allocation3], 0  ;;  %vm46_vm1 = vcmask 1041408   ;;  %v1526_v5 = vmov 65535   ;;  %v22_v8 = vunpack.c.l.bf16 %v20_v4  ;;  %vm41_vm2 = vcmask 23552   ;;  %s1535_s18 = smov [#allocation2]  }
   0x5   :  { %v47_v6 = vsel %vm45_vm0, 4294967295, %v1526_v5  ;;  %v21_v7 = vunpack.c.l.bf16 %v19_v3  ;;  %v83_v21 = vunpack.c.l.b16 %v19_v3  ;;  %v84_v22 = vunpack.c.l.b16 %v20_v4  ;;  %v166_v41 = vld [vmem:[%s2046_s2] sm:$0x3]  ;;  %s1534_s2 = smov 52   ;;  %s1444_s19 = sshll.u32 %s1535_s18, 4  ;;  %s1445_s19 = int_to_ptr.vmem [resolvable:$true] %s1444_s19 }
   0x6   :  { %v48_v10 = vsel %vm46_vm1, %v47_v6, 0  ;;  %v24_v11 = vsub.f32 %v17_v2, %v22_v8  ;;  %v168_v46 = vperm.slane %v166_v41, 0  ;;  %v169_v47 = vperm.slane %v166_v41, 1  ;;  %s1446_s22 = sshll.u32 %s2047_s3, 4  ;;  %s1536_s23 = smov 384   ;;  %s1447_s22 = int_to_ptr.hbm [resolvable:$true] %s1446_s22 }
   0x7   :  { %v23_v9 = vsub.f32 %v16_v1, %v21_v7  ;;  %v85_v29 = vpack.c.b16 %v84_v22, %v83_v21  ;;  %s1537_s24 = smov 24  }
   0x8   :  { %v26_v15 = vpack.c.bf16 %v24_v11, %v24_v11 }
   0x9   :  { %v25_v12 = vpack.c.bf16 %v23_v9, %v23_v9  ;;  %v39_v13 = vld.sshfl [vmem:[#allocation1] sm:$0xff pattern:$0x73625140]  ;;  %v40_v14 = vld.sshfl [vmem:[#allocation1 + $0x8] sm:$0xff pattern:$0x73625140] }
   0xa   :  { %v49_v16 = vand.u32 %v48_v10, %v39_v13  ;;  %v51_v17 = vand.u32 %v48_v10, %v40_v14  ;;  %86 = vst [vmem:[#allocation1] ss:$4 sm:$0xff] %v18_v0  ;;  %v35_v19 = vunpack.c.l.b16 %v26_v15  ;;  %v28_v28 = vunpack.c.l.bf16 %v26_v15 }
   0xb   :  { %v34_v18 = vunpack.c.l.b16 %v25_v12  ;;  %v27_v27 = vunpack.c.l.bf16 %v25_v12 }
   0xc   :  { %60 = vmatpush.bf16.msra.mxu0 %v49_v16  ;;  %74 = vmatpush.bf16.msra.mxu1 %v51_v17  ;;  %v30_v31 = vsub.f32 %v24_v11, %v28_v28  ;;  %v1528_v28 = vmov 2131351028  }
   0xd   :  { %v36_v20 = vpack.c.b16 %v35_v19, %v34_v18  ;;  %v29_v30 = vsub.f32 %v23_v9, %v27_v27 }
   0xf   :  { %1458 = vmatmul.msk.bf16.vlgmr.msra.gmra.mxu0 %vm41_vm2, %v36_v20  ;;  %1459 = vmatmul.msk.bf16.vlgmr.msra.gmra.mxu1 %vm41_vm2, %v36_v20  ;;  %v31_v36 = vpack.c.bf16 %v30_v31, %v29_v30 }
  0x11   :  { %v87_v23 = vld.sshfl [vmem:[#allocation1] sm:$0xff pattern:$0x73625140]  ;;  %v88_v24 = vld.sshfl [vmem:[#allocation1 + $0x8] sm:$0xff pattern:$0x73625140] }
  0x12   :  { %v92_v25 = vand.u32 %v87_v23, %v48_v10  ;;  %v94_v26 = vand.u32 %v88_v24, %v48_v10  ;;  %124 = vst [vmem:[#allocation1] ss:$4 sm:$0xff] %v18_v0 }
  0x14   :  { %103 = vmatpush.bf16.msra.mxu2 %v92_v25  ;;  %117 = vmatpush.bf16.msra.mxu3 %v94_v26  ;;  %v1527_v26 = vmov 2475754826  }
  0x17   :  { %1460 = vmatmul.msk.bf16.vlgmr.msra.gmra.mxu2 %vm41_vm2, %v85_v29  ;;  %1461 = vmatmul.msk.bf16.vlgmr.msra.gmra.mxu3 %vm41_vm2, %v85_v29 }
  0x19   :  { %v125_v32 = vld.sshfl [vmem:[#allocation1] sm:$0xff pattern:$0x73625140]  ;;  %v126_v33 = vld.sshfl [vmem:[#allocation1 + $0x8] sm:$0xff pattern:$0x73625140] }
  0x1a   :  { %v130_v34 = vand.u32 %v125_v32, %v48_v10  ;;  %v132_v35 = vand.u32 %v126_v33, %v48_v10 }
  0x1c   :  { %141 = vmatpush.bf16.msrb.mxu0 %v130_v34  ;;  %155 = vmatpush.bf16.msrb.mxu1 %v132_v35  ;;  %v1529_v34 = vmov 2102212464  }
  0x1f   :  { %1462 = vmatmul.msk.bf16.vlgmr.msrb.gmra.mxu0 %vm41_vm2, %v31_v36  ;;  %1463 = vmatmul.msk.bf16.vlgmr.msrb.gmra.mxu1 %vm41_vm2, %v31_v36 }
  0x8c   :  { %v62_v37 = vpop.f32.mrf.mxu0  ;;  %v76_v38 = vpop.f32.mrf.mxu1 }
  0x94   :  { %v64_v39 = vpop.f32.mrf.mxu0  ;;  %v78_v40 = vpop.f32.mrf.mxu1 }
  0x9a   :  { %v105_v42 = vpop.f32.mrf.mxu2  ;;  %v119_v43 = vpop.f32.mrf.mxu3 }
  0x9b   :  { %v106_v44 = vadd.f32 %v105_v42, %v62_v37  ;;  %v120_v45 = vadd.f32 %v119_v43, %v76_v38  ;;  %v1530_v38 = vmov 683565275   ;;  %v1531_v42 = vmov 920167782  }
  0x9c   :  { %v143_v48 = vpop.f32.mrf.mxu0  ;;  %v157_v49 = vpop.f32.mrf.mxu1 }
  0x9d   :  { %v162_v50 = vadd.f32 %v143_v48, %v106_v44  ;;  %v163_v51 = vadd.f32 %v157_v49, %v120_v45 }
  0x9f   :  { %v1576_v52 = vmul.f32 %v168_v46, %v162_v50  ;;  %v1578_v53 = vmul.f32 %v169_v47, %v163_v51 }
  0xa1   :  { %v179_v54 = vand.u32 2139095040, %v1576_v52  ;;  %v334_v55 = vand.u32 2139095040, %v1578_v53  ;;  %v176_v56 = vand.u32 2147483647, %v1576_v52  ;;  %v331_v9 = vand.u32 2147483647, %v1578_v53 }
  0xa2   :  { %v107_v57 = vpop.f32.mrf.mxu2  ;;  %v121_v58 = vpop.f32.mrf.mxu3 }
  0xa3   :  { %v180_v59 = vshrl.u32 %v179_v54, 23  ;;  %v335_v60 = vshrl.u32 %v334_v55, 23  ;;  %v108_v61 = vadd.f32 %v107_v57, %v64_v39  ;;  %v122_v62 = vadd.f32 %v121_v58, %v78_v40 }
  0xa4   :  { %v145_v63 = vpop.f32.mrf.mxu0  ;;  %v159_v0 = vpop.f32.mrf.mxu1  ;;  %v183_v4 = vand.u32 8388607, %v176_v56  ;;  %v338_v18 = vand.u32 8388607, %v331_v9  ;;  %v1532_v57 = vmov 1326507024  }
  0xa5   :  { %v1464_v1 = vadd.s32 4294967169, %v180_v59  ;;  %v1467_v2 = vadd.s32 4294967169, %v335_v60  ;;  %v165_v3 = vadd.f32 %v159_v0, %v122_v62  ;;  %v164_v5 = vadd.f32 %v145_v63, %v108_v61 }
  0xa6   :  { %v184_v11 = vor.u32 8388608, %v183_v4  ;;  %v339_v25 = vor.u32 8388608, %v338_v18 }
  0xa7   :  { %v186_v6 = vadd.s32 1, %v1464_v1  ;;  %v341_v7 = vadd.s32 1, %v1467_v2  ;;  %v1585_v8 = vmul.f32 %v169_v47, %v165_v3  ;;  %v1589_v14 = vmul.f32 %v168_v46, %v164_v5 }
  0xa8   :  { %v1595_v20 = vshll.u32 %v184_v11, 8 }
  0xa9   :  { %vm187_vm3 = vcmp.gt.s32.totalorder %v186_v6, 0  ;;  %vm342_vm4 = vcmp.gt.s32.totalorder %v341_v7, 0  ;;  %v644_v10 = vand.u32 2139095040, %v1585_v8  ;;  %v489_v21 = vand.u32 2139095040, %v1589_v14 }
  0xaa   :  { %v188_v12 = vsel %vm187_vm3, %v186_v6, 0  ;;  %v343_v13 = vsel %vm342_vm4, %v341_v7, 0  ;;  %v1604_v30 = vand.u32 65535, %v1595_v20  ;;  %v1607_v31 = vshrl.u32 %v1595_v20, 16 }
  0xab   :  { %v190_v15 = vand.u32 31, %v188_v12  ;;  %v1591_v16 = vand.u32 31, %v343_v13  ;;  %v645_v17 = vshrl.u32 %v644_v10, 23  ;;  %v1609_v32 = vshrl.u32 %v188_v12, 5 }
  0xac   :  { %v490_v33 = vshrl.u32 %v489_v21, 23  ;;  %v1612_v36 = vshrl.u32 %v343_v13, 5 }
  0xad   :  { %v191_v19 = vsub.s32 32, %v190_v15  ;;  %v1473_v22 = vadd.s32 4294967169, %v645_v17  ;;  %v1599_v23 = vsub.s32 32, %v1591_v16  ;;  %v193_v39 = vshll.u32 %v1530_v38, %v190_v15 }
  0xae   :  { %v196_v40 = vshll.u32 %v1527_v26, %v190_v15  ;;  %v357_v41 = vshll.u32 %v1529_v34, %v1591_v16  ;;  %v199_v45 = vshll.u32 %v1528_v28, %v190_v15  ;;  %v202_v48 = vshll.u32 %v1529_v34, %v190_v15 }
  0xaf   :  { %v651_v24 = vadd.s32 1, %v1473_v22  ;;  %v194_v27 = vshrl.u32 %v1527_v26, %v191_v19  ;;  %v197_v29 = vshrl.u32 %v1528_v28, %v191_v19  ;;  %v200_v35 = vshrl.u32 %v1529_v34, %v191_v19 }
  0xb0   :  { %v358_v43 = vshrl.u32 %v1531_v42, %v1599_v23  ;;  %v203_v49 = vshrl.u32 %v1531_v42, %v191_v19  ;;  %v360_v50 = vshll.u32 %v1531_v42, %v1591_v16  ;;  %v1470_v51 = vadd.s32 4294967169, %v490_v33 }
  0xb1   :  { %vm652_vm5 = vcmp.gt.s32.totalorder %v651_v24, 0  ;;  %v195_v46 = vor.u32 %v194_v27, %v193_v39  ;;  %v198_v47 = vor.u32 %v197_v29, %v196_v40  ;;  %v201_v55 = vor.u32 %v200_v35, %v199_v45 }
  0xb2   :  { %v1614_v37 = vsel %vm652_vm5, %v651_v24, 0  ;;  %v361_v58 = vshrl.u32 %v1532_v57, %v1599_v23  ;;  %v204_v59 = vor.u32 %v203_v49, %v202_v48  ;;  %v205_v60 = vshll.u32 %v1531_v42, %v190_v15 }
  0xb3   :  { %v1623_v44 = vand.u32 31, %v1614_v37  ;;  %v206_v61 = vshrl.u32 %v1532_v57, %v191_v19  ;;  %v192_v0 = vshrl.u32 %v1530_v38, %v191_v19  ;;  %vm208_vm6 = vcmp.lt.s32.totalorder %v1609_v32, 1 }
  0xb4   :  { %v1647_v1 = vor.u32 %v358_v43, %v357_v41  ;;  %vm211_vm7 = vcmp.lt.s32.totalorder %v1609_v32, 4  ;;  %v216_v3 = vsel %vm208_vm6, %v195_v46, %v198_v47  ;;  %vm210_vm8 = vcmp.lt.s32.totalorder %v1609_v32, 3 }
  0xb5   :  { %v1631_v54 = vsub.s32 32, %v1623_v44  ;;  %v1639_v62 = vshll.u32 %v1531_v42, %v1623_v44  ;;  %v207_v2 = vor.u32 %v206_v61, %v205_v60  ;;  %v213_v5 = vsel %vm211_vm7, %v201_v55, 2102212464 }
  0xb6   :  { %v217_v6 = vsel %vm211_vm7, %v204_v59, 920167782  ;;  %vm209_vm9 = vcmp.lt.s32.totalorder %v1609_v32, 2  ;;  %v220_v10 = vsel %vm208_vm6, %v198_v47, %v201_v55  ;;  %v362_v12 = vor.u32 %v361_v58, %v360_v50 }
  0xb7   :  { %v1643_v63 = vshrl.u32 %v1532_v57, %v1631_v54  ;;  %v218_v7 = vsel %vm210_vm8, %v201_v55, %v217_v6  ;;  %v221_v11 = vsel %vm211_vm7, %v207_v2, 1326507024  ;;  %v212_v13 = vsel %vm208_vm6, %v192_v0, %v195_v46 }
  0xb8   :  { %v219_v15 = vsel %vm209_vm9, %v216_v3, %v218_v7  ;;  %v1656_v17 = vshll.u32 %v339_v25, 8  ;;  %v214_v18 = vsel %vm210_vm8, %v198_v47, %v213_v5  ;;  %v222_v19 = vsel %vm210_vm8, %v204_v59, %v221_v11 }
  0xb9   :  { %v672_v4 = vor.u32 %v1643_v63, %v1639_v62  ;;  %v249_v21 = vand.u32 65535, %v219_v15  ;;  %v250_v22 = vshrl.u32 %v219_v15, 16  ;;  %vm366_vm10 = vcmp.lt.s32.totalorder %v1612_v36, 4 }
  0xba   :  { %v1659_v24 = vadd.s32 1, %v1470_v51  ;;  %v223_v27 = vsel %vm209_vm9, %v220_v10, %v222_v19  ;;  %v349_v29 = vshrl.u32 %v1527_v26, %v1599_v23  ;;  %v372_v33 = vsel %vm366_vm10, %v1647_v1, 920167782 }
  0xbb   :  { %v227_v25 = vand.u32 65535, %v223_v27  ;;  %v228_v35 = vshrl.u32 %v223_v27, 16  ;;  %v252_v39 = vmul.u32 %v250_v22, %v1604_v30  ;;  %v376_v40 = vsel %vm366_vm10, %v362_v12, 1326507024 }
  0xbc   :  { %v1673_v41 = vsel %vm209_vm9, %v212_v13, %v214_v18  ;;  %v253_v43 = vmul.u32 %v249_v21, %v1607_v31  ;;  %v348_v45 = vshll.u32 %v1530_v38, %v1591_v16  ;;  %v251_v48 = vmul.u32 %v249_v21, %v1604_v30 }
  0xbd   :  { %v230_v46 = vmul.u32 %v228_v35, %v1604_v30  ;;  %v231_v47 = vmul.u32 %v227_v25, %v1607_v31  ;;  %v254_v49 = vmul.u32 %v250_v22, %v1607_v31  ;;  %v229_v50 = vmul.u32 %v227_v25, %v1604_v30 }
  0xbe   :  { %v255_v51 = vshll.u32 %v252_v39, 16  ;;  %v1683_v55 = vor.u32 %v349_v29, %v348_v45  ;;  %v351_v32 = vshll.u32 %v1527_v26, %v1591_v16  ;;  %v232_v58 = vmul.u32 %v228_v35, %v1607_v31 }
  0xbf   :  { %v233_v59 = vshll.u32 %v230_v46, 16  ;;  %v256_v60 = vshrl.u32 %v252_v39, 16  ;;  %v257_v61 = vshll.u32 %v253_v43, 16  ;;  %v235_v0 = vshll.u32 %v231_v47, 16 }
  0xc0   :  { %vm259_vm11 = vc.u32 %v251_v48, %v255_v51  ;;  %v261_v2 = vadd.s32 %v255_v51, %v251_v48  ;;  %v352_v3 = vshrl.u32 %v1528_v28, %v1599_v23  ;;  %v1533_v30 = vmov 0  }
  0xc1   :  { %vm237_vm12 = vc.u32 %v229_v50, %v233_v59  ;;  %v239_v5 = vadd.s32 %v233_v59, %v229_v50  ;;  %v260_v6 = vsel %vm259_vm11, 1, %v1533_v30  ;;  %v355_v7 = vshrl.u32 %v1529_v34, %v1599_v23 }
  0xc2   :  { %v238_v10 = vsel %vm237_vm12, 1, %v1533_v30  ;;  %v262_v31 = vadd.s32 %v260_v6, %v254_v49  ;;  %vm263_vm13 = vc.u32 %v261_v2, %v257_v61  ;;  %v354_v11 = vshll.u32 %v1528_v28, %v1591_v16 }
  0xc3   :  { %v240_v12 = vadd.s32 %v238_v10, %v232_v58  ;;  %vm241_vm14 = vc.u32 %v239_v5, %v235_v0  ;;  %v264_v13 = vsel %vm263_vm13, 1, %v1533_v30  ;;  %v1697_v15 = vor.u32 %v352_v3, %v351_v32 }
  0xc4   :  { %v242_v18 = vsel %vm241_vm14, 1, %v1533_v30  ;;  %v258_v19 = vshrl.u32 %v253_v43, 16  ;;  %v266_v21 = vadd.s32 %v264_v13, %v262_v31  ;;  %v356_v22 = vor.u32 %v355_v7, %v354_v11 }
  0xc5   :  { %v234_v27 = vshrl.u32 %v230_v46, 16  ;;  %v244_v29 = vadd.s32 %v242_v18, %v240_v12  ;;  %vm363_vm15 = vcmp.lt.s32.totalorder %v1612_v36, 1  ;;  %vm365_vm0 = vcmp.lt.s32.totalorder %v1612_v36, 3 }
  0xc6   :  { %v267_v25 = vadd.s32 %v266_v21, %v256_v60  ;;  %vm364_vm1 = vcmp.lt.s32.totalorder %v1612_v36, 2  ;;  %v371_v16 = vsel %vm363_vm15, %v1683_v55, %v1697_v15  ;;  %v373_v35 = vsel %vm365_vm0, %v356_v22, %v372_v33 }
  0xc7   :  { %v236_v39 = vshrl.u32 %v231_v47, 16  ;;  %v245_v43 = vadd.s32 %v244_v29, %v234_v27  ;;  %v374_v45 = vsel %vm364_vm1, %v371_v16, %v373_v35  ;;  %v375_v46 = vsel %vm363_vm15, %v1697_v15, %v356_v22 }
  0xc8   :  { %v1714_v48 = vadd.s32 %v261_v2, %v257_v61  ;;  %v268_v49 = vadd.s32 %v267_v25, %v258_v19  ;;  %v377_v50 = vsel %vm365_vm0, %v1647_v1, %v376_v40  ;;  %v380_v51 = vand.u32 65535, %v1656_v17 }
  0xc9   :  { %v1720_v32 = vadd.s32 %v245_v43, %v236_v39  ;;  %v378_v33 = vsel %vm364_vm1, %v375_v46, %v377_v50  ;;  %v381_v47 = vshrl.u32 %v1656_v17, 16  ;;  %v404_v58 = vand.u32 65535, %v374_v45 }
  0xca   :  { %v272_v59 = vadd.s32 1, %v268_v49  ;;  %v382_v60 = vand.u32 65535, %v378_v33  ;;  %v383_v0 = vshrl.u32 %v378_v33, 16  ;;  %v405_v61 = vshrl.u32 %v374_v45, 16 }
  0xcb   :  { %vm497_vm2 = vcmp.gt.s32.totalorder %v1659_v24, 0  ;;  %v269_v2 = vmul.u32 %v1595_v20, %v1673_v41  ;;  %vm271_vm3 = vc.u32 %v1720_v32, %v1714_v48  ;;  %v408_v11 = vmul.u32 %v404_v58, %v381_v47 }
  0xcc   :  { %v273_v1 = vsel %vm271_vm3, %v272_v59, %v268_v49  ;;  %v385_v40 = vmul.u32 %v383_v0, %v380_v51  ;;  %v386_v3 = vmul.u32 %v382_v60, %v381_v47  ;;  %v407_v6 = vmul.u32 %v405_v61, %v380_v51 }
  0xcd   :  { %v274_v5 = vadd.s32 %v273_v1, %v269_v2  ;;  %v498_v7 = vsel %vm497_vm2, %v1659_v24, 0  ;;  %v384_v10 = vmul.u32 %v382_v60, %v380_v51  ;;  %v387_v13 = vmul.u32 %v383_v0, %v381_v47 }
  0xce   :  { %v388_v31 = vshll.u32 %v385_v40, 16  ;;  %v406_v18 = vmul.u32 %v404_v58, %v380_v51  ;;  %v410_v19 = vshll.u32 %v407_v6, 16  ;;  %v390_v21 = vshll.u32 %v386_v3, 16 }
  0xcf   :  { %v275_v12 = vadd.s32 536870912, %v274_v5  ;;  %v409_v41 = vmul.u32 %v405_v61, %v381_v47  ;;  %v412_v35 = vshll.u32 %v408_v11, 16  ;;  %v368_v46 = vsel %vm366_vm10, %v356_v22, 2102212464 }
  0xd0   :  { %vm392_vm4 = vc.u32 %v384_v10, %v388_v31  ;;  %v394_v20 = vadd.s32 %v388_v31, %v384_v10  ;;  %vm414_vm5 = vc.u32 %v406_v18, %v410_v19  ;;  %v416_v25 = vadd.s32 %v410_v19, %v406_v18 }
  0xd1   :  { %v276_v27 = vshrl.u32 %v275_v12, 30  ;;  %v393_v29 = vsel %vm392_vm4, 1, %v1533_v30  ;;  %v415_v24 = vsel %vm414_vm5, 1, %v1533_v30  ;;  %v389_v49 = vshrl.u32 %v385_v40, 16 }
  0xd2   :  { %v395_v16 = vadd.s32 %v393_v29, %v387_v13  ;;  %vm396_vm6 = vc.u32 %v394_v20, %v390_v21  ;;  %v417_v45 = vadd.s32 %v415_v24, %v409_v41  ;;  %vm418_vm7 = vc.u32 %v416_v25, %v412_v35 }
  0xd3   :  { %v277_v39 = vshll.u32 %v276_v27, 30  ;;  %v397_v43 = vsel %vm396_vm6, 1, %v1533_v30  ;;  %v500_v51 = vand.u32 31, %v498_v7  ;;  %v347_v47 = vshrl.u32 %v1530_v38, %v1599_v23 }
  0xd4   :  { %v399_v50 = vadd.s32 %v397_v43, %v395_v16  ;;  %v419_v58 = vsel %vm418_vm7, 1, %v1533_v30  ;;  %v391_v59 = vshrl.u32 %v386_v3, 16  ;;  %v411_v0 = vshrl.u32 %v407_v6, 16 }
  0xd5   :  { %v278_v33 = vsub.s32 %v274_v5, %v277_v39  ;;  %v421_v61 = vadd.s32 %v419_v58, %v417_v45  ;;  %v367_v22 = vsel %vm363_vm15, %v347_v47, %v1683_v55  ;;  %v369_v1 = vsel %vm365_vm0, %v1697_v15, %v368_v46 }
  0xd6   :  { %v400_v60 = vadd.s32 %v399_v50, %v389_v49  ;;  %v413_v5 = vshrl.u32 %v408_v11, 16  ;;  %v300_v31 = vsub.s32 4, %v276_v27  ;;  %v1747_v3 = vadd.s32 %v416_v25, %v412_v35 }
  0xd7   :  { %vm279_vm8 = vcmp.lt.s32.totalorder %v278_v33, 0  ;;  %v280_v2 = vsub.s32 0, %v278_v33  ;;  %v422_v23 = vadd.s32 %v421_v61, %v411_v0  ;;  %v486_v6 = vand.u32 2147483647, %v1589_v14 }
  0xd8   :  { %v1745_v40 = vadd.s32 %v400_v60, %v391_v59  ;;  %v1750_v12 = vsub.s32 32, %v500_v51  ;;  %v370_v55 = vsel %vm364_vm1, %v367_v22, %v369_v1  ;;  %vm178_vm9 = vcmp.lt.s32.totalorder %v1576_v52, 0 }
  0xd9   :  { %v281_v10 = vsel %vm279_vm8, %v280_v2, %v278_v33  ;;  %v423_v18 = vadd.s32 %v422_v23, %v413_v5  ;;  %v1757_v15 = vshrl.u32 %v498_v7, 5  ;;  %vm1761_vm11 = vcmp.le.f32.partialorder %v176_v56, 0.7853982 }
  0xda   :  { %v282_v13 = vclz %v281_v10  ;;  %vm426_vm10 = vc.u32 %v1745_v40, %v1747_v3  ;;  %v270_v36 = vadd.s32 %v1714_v48, %v1720_v32  ;;  %v301_v20 = vsel %vm178_vm9, %v300_v31, %v276_v27 }
  0xdb   :  { %v427_v21 = vadd.s32 1, %v423_v18  ;;  %v424_v41 = vmul.u32 %v1656_v17, %v370_v55  ;;  %v493_v7 = vand.u32 8388607, %v486_v6  ;;  %v503_v56 = vshll.u32 %v1530_v38, %v500_v51 }
  0xdc   :  { %v1465_v19 = vadd.s32 4294967294, %v282_v13  ;;  %v504_v25 = vshrl.u32 %v1527_v26, %v1750_v12  ;;  %v506_v24 = vshll.u32 %v1527_v26, %v500_v51  ;;  %v507_v48 = vshrl.u32 %v1528_v28, %v1750_v12 }
  0xdd   :  { %v428_v29 = vsel %vm426_vm10, %v427_v21, %v423_v18  ;;  %v512_v17 = vshll.u32 %v1529_v34, %v500_v51  ;;  %v513_v39 = vshrl.u32 %v1531_v42, %v1750_v12  ;;  %v510_v46 = vshrl.u32 %v1529_v34, %v1750_v12 }
  0xde   :  { %vm1466_vm12 = vcmp.lt.s32.totalorder %v1465_v19, 0  ;;  %v429_v35 = vadd.s32 %v428_v29, %v424_v41  ;;  %v516_v49 = vshrl.u32 %v1532_v57, %v1750_v12  ;;  %v515_v59 = vshll.u32 %v1531_v42, %v500_v51 }
  0xdf   :  { %v285_v16 = vsel %vm1466_vm12, 0, %v1465_v19  ;;  %v514_v58 = vor.u32 %v513_v39, %v512_v17  ;;  %v303_v60 = vsel %vm1761_vm11, 0, %v301_v20  ;;  %v505_v61 = vor.u32 %v504_v25, %v503_v56 }
  0xe0   :  { %v286_v32 = vsub.s32 32, %v285_v16  ;;  %v290_v27 = vsub.s32 4294967266, %v285_v16  ;;  %v287_v43 = vshll.u32 %v278_v33, %v285_v16  ;;  %v430_v45 = vadd.s32 536870912, %v429_v35 }
  0xe1   :  { %v509_v33 = vshll.u32 %v1528_v28, %v500_v51  ;;  %v508_v1 = vor.u32 %v507_v48, %v506_v24  ;;  %v517_v5 = vor.u32 %v516_v49, %v515_v59  ;;  %v1792_v23 = vshrl.u32 %v1614_v37, 5 }
  0xe2   :  { %v288_v50 = vshrl.u32 %v270_v36, %v286_v32  ;;  %v291_v47 = vadd.s32 127, %v290_v27  ;;  %v1788_v0 = vshrl.u32 %v430_v45, 30  ;;  %vm521_vm13 = vcmp.lt.s32.totalorder %v1757_v15, 4 }
  0xe3   :  { %v511_v10 = vor.u32 %v510_v46, %v509_v33  ;;  %v1798_v31 = vshll.u32 %v1529_v34, %v1623_v44  ;;  %v494_v55 = vor.u32 8388608, %v493_v7  ;;  %v527_v51 = vsel %vm521_vm13, %v514_v58, 920167782 }
  0xe4   :  { %v289_v2 = vor.u32 %v288_v50, %v287_v43  ;;  %v292_v22 = vshll.u32 %v291_v47, 23  ;;  %v432_v57 = vshll.u32 %v1788_v0, 30  ;;  %v320_v18 = vadd.s32 3, %v303_v60 }
  0xe5   :  { %vm518_vm14 = vcmp.lt.s32.totalorder %v1757_v15, 1  ;;  %vm520_vm15 = vcmp.lt.s32.totalorder %v1757_v15, 3  ;;  %v531_v20 = vsel %vm521_vm13, %v517_v5, 1326507024  ;;  %v1818_v56 = vshrl.u32 %v1531_v42, %v1631_v54 }
  0xe6   :  { %v293_v13 = vor.u32 4788187, %v292_v22  ;;  %v1802_v19 = vsub.s32 %v429_v35, %v432_v57  ;;  %v296_v21 = vcvt.s32.f32 %v289_v2  ;;  %v526_v36 = vsel %vm518_vm14, %v505_v61, %v508_v1 }
  0xe7   :  { %v528_v7 = vsel %vm520_vm15, %v511_v10, %v527_v51  ;;  %v530_v29 = vsel %vm518_vm14, %v508_v1, %v511_v10  ;;  %v532_v16 = vsel %vm520_vm15, %v514_v58, %v531_v20  ;;  %v1822_v35 = vshll.u32 %v494_v55, 8 }
  0xe8   :  { %v294_v37 = vand.u32 2147483647, %v293_v13  ;;  %vm434_vm0 = vcmp.lt.s32.totalorder %v1802_v19, 0  ;;  %v435_v41 = vsub.s32 0, %v1802_v19  ;;  %v1824_v24 = vand.u32 3, %v303_v60 }
  0xe9   :  { %v502_v32 = vshrl.u32 %v1530_v38, %v1750_v12  ;;  %vm519_vm1 = vcmp.lt.s32.totalorder %v1757_v15, 2  ;;  %v1836_v43 = vand.u32 3, %v320_v18  ;;  %v425_v45 = vadd.s32 %v1747_v3, %v1745_v40 }
  0xea   :  { %v297_v25 = vmul.f32 %v296_v21, %v294_v37  ;;  %v436_v48 = vsel %vm434_vm0, %v435_v41, %v1802_v19  ;;  %v1832_v42 = vsel %vm519_vm1, %v526_v36, %v528_v7  ;;  %v533_v39 = vsel %vm519_vm1, %v530_v29, %v532_v16 }
  0xeb   :  { %v437_v17 = vclz %v436_v48  ;;  %v1842_v46 = vsel %vm518_vm14, %v502_v32, %v505_v61  ;;  %v523_v12 = vsel %vm521_vm13, %v511_v10, 2102212464  ;;  %v535_v47 = vand.u32 65535, %v1822_v35 }
  0xec   :  { %v298_v27 = vxor.u32 2147483648, %v297_v25  ;;  %v537_v58 = vand.u32 65535, %v533_v39  ;;  %v536_v40 = vshrl.u32 %v1822_v35, 16  ;;  %v538_v3 = vshrl.u32 %v533_v39, 16 }
  0xed   :  { %v1468_v50 = vadd.s32 4294967294, %v437_v17  ;;  %v560_v60 = vshrl.u32 %v1832_v42, 16  ;;  %v455_v33 = vsub.s32 4, %v1788_v0  ;;  %v1861_v2 = vsel %vm520_vm15, %v508_v1, %v523_v12 }
  0xee   :  { %v299_v49 = vsel %vm178_vm9, %v298_v27, %v297_v25  ;;  %v540_v5 = vmul.u32 %v538_v3, %v535_v47  ;;  %v1863_v11 = vmul.u32 %v537_v58, %v536_v40  ;;  %v559_v57 = vand.u32 65535, %v1832_v42 }
  0xef   :  { %v1852_v59 = vsel %vm1761_vm11, %v1576_v52, %v299_v49  ;;  %vm1469_vm2 = vcmp.lt.s32.totalorder %v1468_v50, 0  ;;  %v539_v51 = vmul.u32 %v537_v58, %v535_v47  ;;  %v542_v37 = vmul.u32 %v538_v3, %v536_v40 }
  0xf0   :  { %v304_v61 = vmul.f32 %v1852_v59, %v1852_v59  ;;  %v440_v22 = vsel %vm1469_vm2, 0, %v1468_v50  ;;  %v543_v21 = vshll.u32 %v540_v5, 16  ;;  %v1866_v36 = vmul.u32 %v560_v60, %v535_v47 }
  0xf1   :  { %v441_v55 = vsub.s32 32, %v440_v22  ;;  %v445_v18 = vsub.s32 4294967266, %v440_v22  ;;  %vm333_vm3 = vcmp.lt.s32.totalorder %v1578_v53, 0  ;;  %v442_v1 = vshll.u32 %v1802_v19, %v440_v22 }
  0xf2   :  { %v305_v10 = vmul.f32 -0.001358992, %v304_v61  ;;  %v312_v13 = vmul.f32 -0.00019511016, %v304_v61  ;;  %v545_v25 = vshll.u32 %v1863_v11, 16  ;;  %vm547_vm4 = vc.u32 %v539_v51, %v543_v21 }
  0xf3   :  { %v443_v7 = vshrl.u32 %v425_v45, %v441_v55  ;;  %v446_v29 = vadd.s32 127, %v445_v18  ;;  %v549_v16 = vadd.s32 %v543_v21, %v539_v51  ;;  %v548_v17 = vsel %vm547_vm4, 1, %v1533_v30 }
  0xf4   :  { %v306_v20 = vadd.f32 0.041655596, %v305_v10  ;;  %v313_v41 = vadd.f32 0.008332121, %v312_v13  ;;  %vm1874_vm5 = vcmp.le.f32.partialorder %v331_v9, 0.7853982  ;;  %v550_v12 = vadd.s32 %v548_v17, %v542_v37 }
  0xf5   :  { %v444_v27 = vor.u32 %v443_v7, %v442_v1  ;;  %v447_v39 = vshll.u32 %v446_v29, 23  ;;  %vm551_vm6 = vc.u32 %v549_v16, %v545_v25  ;;  %v563_v19 = vmul.u32 %v559_v57, %v536_v40 }
  0xf6   :  { %v307_v48 = vmul.f32 %v306_v20, %v304_v61  ;;  %v314_v32 = vmul.f32 %v313_v41, %v304_v61  ;;  %vm945_vm7 = vcmp.eq.s32.totalorder %v1824_v24, 2  ;;  %v552_v50 = vsel %vm551_vm6, 1, %v1533_v30 }
  0xf7   :  { %v561_v58 = vmul.u32 %v559_v57, %v535_v47  ;;  %vm323_vm8 = vcmp.eq.s32.totalorder %v1836_v43, 0  ;;  %vm326_vm9 = vcmp.eq.s32.totalorder %v1836_v43, 2  ;;  %vm942_vm10 = vcmp.eq.s32.totalorder %v1824_v24, 0 }
  0xf8   :  { %v308_v45 = vadd.f32 -0.4999988, %v307_v48  ;;  %v315_v49 = vadd.f32 -0.16666654, %v314_v32  ;;  %v448_v9 = vor.u32 4788187, %v447_v39  ;;  %v554_v22 = vadd.s32 %v552_v50, %v550_v12 }
  0xf9   :  { %v544_v3 = vshrl.u32 %v540_v5, 16  ;;  %v565_v10 = vshll.u32 %v1866_v36, 16  ;;  %vm322_vm11 = vcmp.lt.s32.totalorder %v1836_v43, 2  ;;  %vm941_vm12 = vcmp.lt.s32.totalorder %v1824_v24, 2 }
  0xfa   :  { %v309_v13 = vmul.f32 %v308_v45, %v304_v61  ;;  %v316_v55 = vmul.f32 %v315_v49, %v304_v61  ;;  %v451_v51 = vcvt.s32.f32 %v444_v27  ;;  %v564_v18 = vmul.u32 %v560_v60, %v536_v40 }
  0xfb   :  { %vm319_vm13 = vweird.f32 %v1576_v52  ;;  %v449_v47 = vand.u32 2147483647, %v448_v9  ;;  %v567_v57 = vshll.u32 %v563_v19, 16  ;;  %vm569_vm14 = vc.u32 %v561_v58, %v565_v10 }
  0xfc   :  { %v571_v37 = vadd.s32 %v565_v10, %v561_v58  ;;  %v310_v21 = vadd.f32 1.0, %v309_v13  ;;  %v317_v20 = vadd.f32 1.0, %v316_v55  ;;  %v555_v5 = vadd.s32 %v554_v22, %v544_v3 }
  0xfd   :  { %v570_v41 = vsel %vm569_vm14, 1, %v1533_v30  ;;  %vm676_vm15 = vcmp.lt.s32.totalorder %v1792_v23, 4  ;;  %v452_v61 = vmul.f32 %v451_v51, %v449_v47  ;;  %v456_v1 = vsel %vm333_vm3, %v455_v33, %v1788_v0 }
  0xfe   :  { %v572_v7 = vadd.s32 %v570_v41, %v564_v18  ;;  %vm573_vm0 = vc.u32 %v571_v37, %v567_v57  ;;  %v318_v40 = vmul.f32 %v317_v20, %v1852_v59  ;;  %v327_v60 = vxor.u32 2147483648, %v310_v21 }
  0xff   :  { %v546_v29 = vshrl.u32 %v1863_v11, 16  ;;  %v574_v25 = vsel %vm573_vm0, 1, %v1533_v30  ;;  %v453_v16 = vxor.u32 2147483648, %v452_v61  ;;  %v525_v48 = vsel %vm519_vm1, %v1842_v46, %v1861_v2 }
 0x100   :  { %v566_v32 = vshrl.u32 %v1866_v36, 16  ;;  %v576_v27 = vadd.s32 %v574_v25, %v572_v7  ;;  %v324_v17 = vxor.u32 2147483648, %v318_v40  ;;  %v458_v0 = vsel %vm1874_vm5, 0, %v456_v1 }
 0x101   :  { %v1902_v33 = vadd.s32 %v555_v5, %v546_v29  ;;  %v568_v59 = vshrl.u32 %v563_v19, 16  ;;  %v947_v11 = vsel %vm945_vm7, %v327_v60, %v318_v40  ;;  %v454_v39 = vsel %vm333_vm3, %v453_v16, %v452_v61 }
 0x102   :  { %v1908_v12 = vadd.s32 %v571_v37, %v567_v57  ;;  %v577_v15 = vadd.s32 %v576_v27, %v566_v32  ;;  %v944_v46 = vsel %vm942_vm10, %v310_v21, %v324_v17  ;;  %v325_v2 = vsel %vm323_vm8, %v310_v21, %v324_v17 }
 0x103   :  { %v328_v36 = vsel %vm326_vm9, %v327_v60, %v318_v40  ;;  %v457_v19 = vsel %vm1874_vm5, %v1578_v53, %v454_v39  ;;  %v948_v45 = vsel %vm941_vm12, %v944_v46, %v947_v11  ;;  %v641_v42 = vand.u32 2147483647, %v1585_v8 }
 0x104   :  { %v329_v49 = vsel %vm322_vm11, %v325_v2, %v328_v36  ;;  %v459_v50 = vmul.f32 %v457_v19, %v457_v19  ;;  %v578_v58 = vadd.s32 %v577_v15, %v568_v59  ;;  %v949_v9 = vsel %vm319_vm13, nan, %v948_v45 }
 0x105   :  { %v330_v3 = vsel %vm319_vm13, nan, %v329_v49  ;;  %vm581_vm1 = vc.u32 %v1902_v33, %v1908_v12  ;;  %v669_v24 = vor.u32 %v1818_v56, %v1798_v31  ;;  %1416 = vrot.lane.b32.xlu0 %v949_v9, %s1534_s2  ;;  %v686_v52 = vsel %vm676_vm15, %v672_v4, 1326507024 }
 0x106   :  { %1433 = vst [vmem:[#allocation2] sm:$0xff] %v330_v3  ;;  %v460_v43 = vmul.f32 -0.001358992, %v459_v50  ;;  %v467_v22 = vmul.f32 -0.00019511016, %v459_v50  ;;  %v582_v10 = vadd.s32 1, %v578_v58  ;;  %v579_v55 = vmul.u32 %v1822_v35, %v525_v48 }
 0x107   :  { %v475_v13 = vadd.s32 3, %v458_v0  ;;  %v662_v51 = vshrl.u32 %v1528_v28, %v1631_v54  ;;  %v659_v47 = vshrl.u32 %v1527_v26, %v1631_v54  ;;  %v661_v37 = vshll.u32 %v1527_v26, %v1623_v44 }
 0x108   :  { %v461_v31 = vadd.f32 0.041655596, %v460_v43  ;;  %v468_v56 = vadd.f32 0.008332121, %v467_v22  ;;  %v583_v18 = vsel %vm581_vm1, %v582_v10, %v578_v58  ;;  %v664_v62 = vshll.u32 %v1528_v28, %v1623_v44 }
 0x109   :  { %v584_v57 = vadd.s32 %v583_v18, %v579_v55  ;;  %v665_v63 = vshrl.u32 %v1529_v34, %v1631_v54  ;;  %v648_v21 = vand.u32 8388607, %v641_v42  ;;  %v658_v20 = vshll.u32 %v1530_v38, %v1623_v44 }
 0x10a   :  { %v462_v4 = vmul.f32 %v461_v31, %v459_v50  ;;  %v469_v35 = vmul.f32 %v468_v56, %v459_v50  ;;  %v1953_v41 = vor.u32 %v662_v51, %v661_v37  ;;  %vm675_vm2 = vcmp.lt.s32.totalorder %v1792_v23, 3 }
 0x10b   :  { %v585_v5 = vadd.s32 536870912, %v584_v57  ;;  %v1955_v61 = vor.u32 %v665_v63, %v664_v62  ;;  %v1094_v1 = vand.u32 3, %v458_v0  ;;  %v687_v34 = vsel %vm675_vm2, %v669_v24, %v686_v52 }
 0x10c   :  { %v463_v26 = vadd.f32 -0.4999988, %v462_v4  ;;  %v470_v28 = vadd.f32 -0.16666654, %v469_v35  ;;  %v1962_v40 = vor.u32 %v659_v47, %v658_v20  ;;  %v682_v44 = vsel %vm676_vm15, %v669_v24, 920167782 }
 0x10d   :  { %v1960_v7 = vshrl.u32 %v585_v5, 30  ;;  %vm673_vm3 = vcmp.lt.s32.totalorder %v1792_v23, 1  ;;  %vm474_vm4 = vweird.f32 %v1578_v53  ;;  %v476_v25 = vand.u32 3, %v475_v13 }
 0x10e   :  { %v464_v60 = vmul.f32 %v463_v26, %v459_v50  ;;  %v471_v29 = vmul.f32 %v470_v28, %v459_v50  ;;  %v649_v48 = vor.u32 8388608, %v648_v21  ;;  %v685_v32 = vsel %vm673_vm3, %v1953_v41, %v1955_v61 }
 0x10f   :  { %v587_v16 = vshll.u32 %v1960_v7, 30  ;;  %vm1095_vm5 = vcmp.lt.s32.totalorder %v1094_v1, 2  ;;  %vm1096_vm6 = vcmp.eq.s32.totalorder %v1094_v1, 0  ;;  %vm1099_vm7 = vcmp.eq.s32.totalorder %v1094_v1, 2 }
 0x110   :  { %v465_v27 = vadd.f32 1.0, %v464_v60  ;;  %v472_v17 = vadd.f32 1.0, %v471_v29  ;;  %vm674_vm8 = vcmp.lt.s32.totalorder %v1792_v23, 2  ;;  %v681_v59 = vsel %vm673_vm3, %v1962_v40, %v1953_v41 }
 0x111   :  { %v588_v0 = vsub.s32 %v584_v57, %v587_v16  ;;  %v683_v15 = vsel %vm675_vm2, %v1955_v61, %v682_v44  ;;  %v688_v46 = vsel %vm674_vm8, %v685_v32, %v687_v34  ;;  %vm481_vm9 = vcmp.eq.s32.totalorder %v476_v25, 2 }
 0x112   :  { %v473_v11 = vmul.f32 %v472_v17, %v457_v19  ;;  %v482_v39 = vxor.u32 2147483648, %v465_v27  ;;  %v1983_v36 = vshll.u32 %v649_v48, 8  ;;  %vm477_vm11 = vcmp.lt.s32.totalorder %v476_v25, 2 }
 0x113   :  { %vm589_vm10 = vcmp.lt.s32.totalorder %v588_v0, 0  ;;  %v590_v2 = vsub.s32 0, %v588_v0  ;;  %vm478_vm12 = vcmp.eq.s32.totalorder %v476_v25, 0  ;;  %v684_v19 = vsel %vm674_vm8, %v681_v59, %v683_v15 }
 0x114   :  { %v479_v45 = vxor.u32 2147483648, %v473_v11  ;;  %v483_v49 = vsel %vm481_vm9, %v482_v39, %v473_v11  ;;  %v692_v58 = vand.u32 65535, %v688_v46  ;;  %v693_v9 = vshrl.u32 %v688_v46, 16 }
 0x115   :  { %v591_v50 = vsel %vm589_vm10, %v590_v2, %v588_v0  ;;  %v1101_v43 = vsel %vm1099_vm7, %v482_v39, %v473_v11  ;;  %v690_v13 = vand.u32 65535, %v1983_v36  ;;  %v691_v55 = vshrl.u32 %v1983_v36, 16 }
 0x116   :  { %v480_v3 = vsel %vm478_vm12, %v465_v27, %v479_v45  ;;  %v1098_v24 = vsel %vm1096_vm6, %v465_v27, %v479_v45  ;;  %v592_v22 = vclz %v591_v50  ;;  %v714_v18 = vand.u32 65535, %v684_v19 }
 0x117   :  { %v484_v10 = vsel %vm477_vm11, %v480_v3, %v483_v49  ;;  %v1102_v52 = vsel %vm1095_vm5, %v1098_v24, %v1101_v43  ;;  %v695_v47 = vmul.u32 %v693_v9, %v690_v13  ;;  %v696_v57 = vmul.u32 %v692_v58, %v691_v55 }
 0x118   :  { %v1994_v51 = vsel %vm474_vm4, nan, %v484_v10  ;;  %v1103_v31 = vsel %vm474_vm4, nan, %v1102_v52  ;;  %v1471_v56 = vadd.s32 4294967294, %v592_v22  ;;  %v580_v37 = vadd.s32 %v1908_v12, %v1902_v33 }
 0x119   :  { %1418 = vrot.lane.b32.xlu0 %v1103_v31, %s1534_s2  ;;  %v715_v62 = vshrl.u32 %v684_v19, 16  ;;  %v694_v4 = vmul.u32 %v692_v58, %v690_v13  ;;  %v697_v35 = vmul.u32 %v693_v9, %v691_v55  ;;  %v698_v21 = vshll.u32 %v695_v47, 16 }
 0x11a   :  { %vm1472_vm13 = vcmp.lt.s32.totalorder %v1471_v56, 0  ;;  %v716_v26 = vmul.u32 %v714_v18, %v690_v13  ;;  %v718_v53 = vmul.u32 %v714_v18, %v691_v55  ;;  %v700_v28 = vshll.u32 %v696_v57, 16 }
 0x11b   :  { %v595_v63 = vsel %vm1472_vm13, 0, %v1471_v56  ;;  %vm702_vm14 = vc.u32 %v694_v4, %v698_v21  ;;  %v704_v1 = vadd.s32 %v698_v21, %v694_v4  ;;  %v717_v34 = vmul.u32 %v715_v62, %v690_v13 }
 0x11c   :  { %v596_v20 = vsub.s32 32, %v595_v63  ;;  %v600_v5 = vsub.s32 4294967266, %v595_v63  ;;  %v597_v44 = vshll.u32 %v588_v0, %v595_v63  ;;  %v703_v25 = vsel %vm702_vm14, 1, %v1533_v30 }
 0x11d   :  { %v699_v33 = vshrl.u32 %v695_v47, 16  ;;  %v705_v12 = vadd.s32 %v703_v25, %v697_v35  ;;  %vm706_vm0 = vc.u32 %v704_v1, %v700_v28  ;;  %v720_v16 = vshll.u32 %v717_v34, 16 }
 0x11e   :  { %v598_v60 = vshrl.u32 %v580_v37, %v596_v20  ;;  %v601_v29 = vadd.s32 127, %v600_v5  ;;  %v707_v27 = vsel %vm706_vm0, 1, %v1533_v30  ;;  %v719_v17 = vmul.u32 %v715_v62, %v691_v55 }
 0x11f   :  { %v709_v59 = vadd.s32 %v707_v27, %v705_v12  ;;  %v722_v11 = vshll.u32 %v718_v53, 16  ;;  %vm724_vm1 = vc.u32 %v716_v26, %v720_v16  ;;  %v726_v39 = vadd.s32 %v720_v16, %v716_v26 }
 0x120   :  { %v599_v48 = vor.u32 %v598_v60, %v597_v44  ;;  %v602_v32 = vshll.u32 %v601_v29, 23  ;;  %v678_v0 = vsel %vm676_vm15, %v1955_v61, 2102212464  ;;  %v725_v46 = vsel %vm724_vm1, 1, %v1533_v30 }
 0x121   :  { %v701_v2 = vshrl.u32 %v696_v57, 16  ;;  %v710_v45 = vadd.s32 %v709_v59, %v699_v33  ;;  %v727_v49 = vadd.s32 %v725_v46, %v719_v17  ;;  %vm728_vm4 = vc.u32 %v726_v39, %v722_v11 }
 0x122   :  { %v603_v15 = vor.u32 4788187, %v602_v32  ;;  %v606_v19 = vcvt.s32.f32 %v599_v48  ;;  %v657_v58 = vshrl.u32 %v1530_v38, %v1631_v54  ;;  %v729_v9 = vsel %vm728_vm4, 1, %v1533_v30 }
 0x123   :  { %v711_v3 = vadd.s32 %v710_v45, %v701_v2  ;;  %v721_v24 = vshrl.u32 %v717_v34, 16  ;;  %v730_v43 = vadd.s32 %v726_v39, %v722_v11  ;;  %v731_v22 = vadd.s32 %v729_v9, %v727_v49 }
 0x124   :  { %v604_v50 = vand.u32 2147483647, %v603_v15  ;;  %v677_v61 = vsel %vm673_vm3, %v657_v58, %v1962_v40  ;;  %v679_v52 = vsel %vm675_vm2, %v1953_v41, %v678_v0  ;;  %v723_v13 = vshrl.u32 %v718_v53, 16 }
 0x125   :  { %v732_v55 = vadd.s32 %v731_v22, %v721_v24  ;;  %v2016_v31 = vadd.s32 %v730_v43, %v711_v3  ;;  %vm736_vm15 = vc.u32 %v711_v3, %v730_v43  ;;  %vm488_vm5 = vcmp.lt.s32.totalorder %v1589_v14, 0 }
 0x126   :  { %v607_v10 = vmul.f32 %v606_v19, %v604_v50  ;;  %v680_v54 = vsel %vm674_vm8, %v677_v61, %v679_v52  ;;  %vm487_vm6 = vcmp.le.f32.partialorder %v486_v6, 0.7853982  ;;  %v610_v56 = vsub.s32 4, %v1960_v7 }
 0x127   :  { %v733_v30 = vadd.s32 %v732_v55, %v723_v13  ;;  %v734_v57 = vmul.u32 %v1983_v36, %v680_v54  ;;  %vm629_vm12 = vweird.f32 %v1589_v14  ;;  %vm643_vm14 = vcmp.lt.s32.totalorder %v1585_v8, 0 }
 0x128   :  { %v608_v38 = vxor.u32 2147483648, %v607_v10  ;;  %v611_v23 = vsel %vm488_vm5, %v610_v56, %v1960_v7  ;;  %vm642_vm0 = vcmp.le.f32.partialorder %v641_v42, 0.7853982 }
 0x129   :  { %v737_v18 = vadd.s32 1, %v733_v30  ;;  %v613_v5 = vsel %vm487_vm6, 0, %v611_v23 }
 0x12a   :  { %v609_v40 = vsel %vm488_vm5, %v608_v38, %v607_v10  ;;  %v630_v44 = vadd.s32 3, %v613_v5  ;;  %v1248_v25 = vand.u32 3, %v613_v5 }
 0x12b   :  { %v612_v41 = vsel %vm487_vm6, %v1589_v14, %v609_v40  ;;  %v738_v37 = vsel %vm736_vm15, %v737_v18, %v733_v30 }
 0x12c   :  { %v614_v47 = vmul.f32 %v612_v41, %v612_v41  ;;  %v739_v4 = vadd.s32 %v738_v37, %v734_v57  ;;  %v631_v7 = vand.u32 3, %v630_v44  ;;  %vm1249_vm3 = vcmp.lt.s32.totalorder %v1248_v25, 2 }
 0x12d   :  { %vm1250_vm7 = vcmp.eq.s32.totalorder %v1248_v25, 0  ;;  %vm1253_vm8 = vcmp.eq.s32.totalorder %v1248_v25, 2 }
 0x12e   :  { %v615_v62 = vmul.f32 -0.001358992, %v614_v47  ;;  %v622_v63 = vmul.f32 -0.00019511016, %v614_v47  ;;  %v740_v20 = vadd.s32 536870912, %v739_v4  ;;  %vm632_vm9 = vcmp.lt.s32.totalorder %v631_v7, 2 }
 0x12f   :  { %vm633_vm10 = vcmp.eq.s32.totalorder %v631_v7, 0  ;;  %vm636_vm11 = vcmp.eq.s32.totalorder %v631_v7, 2 }
 0x130   :  { %v616_v35 = vadd.f32 0.041655596, %v615_v62  ;;  %v623_v21 = vadd.f32 0.008332121, %v622_v63  ;;  %v741_v53 = vshrl.u32 %v740_v20, 30 }
 0x132   :  { %v617_v6 = vmul.f32 %v616_v35, %v614_v47  ;;  %v624_v26 = vmul.f32 %v623_v21, %v614_v47  ;;  %v742_v34 = vshll.u32 %v741_v53, 30  ;;  %v765_v38 = vsub.s32 4, %v741_v53 }
 0x134   :  { %v618_v28 = vadd.f32 -0.4999988, %v617_v6  ;;  %v625_v1 = vadd.f32 -0.16666654, %v624_v26  ;;  %v743_v36 = vsub.s32 %v739_v4, %v742_v34  ;;  %v766_v56 = vsel %vm643_vm14, %v765_v38, %v741_v53 }
 0x135   :  { %v768_v18 = vsel %vm642_vm0, 0, %v766_v56 }
 0x136   :  { %v619_v60 = vmul.f32 %v618_v28, %v614_v47  ;;  %v626_v29 = vmul.f32 %v625_v1, %v614_v47  ;;  %vm744_vm2 = vcmp.lt.s32.totalorder %v743_v36, 0  ;;  %v745_v16 = vsub.s32 0, %v743_v36 }
 0x137   :  { %v785_v63 = vadd.s32 3, %v768_v18  ;;  %v1402_v5 = vand.u32 3, %v768_v18 }
 0x138   :  { %v620_v33 = vadd.f32 1.0, %v619_v60  ;;  %v627_v12 = vadd.f32 1.0, %v626_v29  ;;  %v746_v27 = vsel %vm744_vm2, %v745_v16, %v743_v36 }
 0x139   :  { %v747_v17 = vclz %v746_v27  ;;  %v786_v20 = vand.u32 3, %v785_v63  ;;  %vm1407_vm4 = vcmp.eq.s32.totalorder %v1402_v5, 2  ;;  %vm1404_vm5 = vcmp.eq.s32.totalorder %v1402_v5, 0 }
 0x13a   :  { %v628_v48 = vmul.f32 %v627_v12, %v612_v41  ;;  %v637_v32 = vxor.u32 2147483648, %v620_v33  ;;  %vm1403_vm2 = vcmp.lt.s32.totalorder %v1402_v5, 2 }
 0x13b   :  { %v1474_v11 = vadd.s32 4294967294, %v747_v17  ;;  %vm791_vm1 = vcmp.eq.s32.totalorder %v786_v20, 2  ;;  %vm788_vm15 = vcmp.eq.s32.totalorder %v786_v20, 0  ;;  %vm787_vm6 = vcmp.lt.s32.totalorder %v786_v20, 2 }
 0x13c   :  { %v634_v59 = vxor.u32 2147483648, %v628_v48  ;;  %v1255_v15 = vsel %vm1253_vm8, %v637_v32, %v628_v48  ;;  %v638_v46 = vsel %vm636_vm11, %v637_v32, %v628_v48  ;;  %vm1435_vm8 = vcmask 850944  }
 0x13d   :  { %vm1475_vm13 = vcmp.lt.s32.totalorder %v1474_v11, 0 }
 0x13e   :  { %v1252_v39 = vsel %vm1250_vm7, %v620_v33, %v634_v59  ;;  %v635_v0 = vsel %vm633_vm10, %v620_v33, %v634_v59  ;;  %v750_v19 = vsel %vm1475_vm13, 0, %v1474_v11  ;;  %vm1424_vm7 = vcmask 424960  }
 0x13f   :  { %v1256_v2 = vsel %vm1249_vm3, %v1252_v39, %v1255_v15  ;;  %v639_v45 = vsel %vm632_vm9, %v635_v0, %v638_v46  ;;  %v751_v58 = vsub.s32 32, %v750_v19  ;;  %v755_v9 = vsub.s32 4294967266, %v750_v19 }
 0x140   :  { %v1257_v49 = vsel %vm629_vm12, nan, %v1256_v2  ;;  %v640_v50 = vsel %vm629_vm12, nan, %v639_v45  ;;  %v752_v3 = vshll.u32 %v743_v36, %v750_v19  ;;  %vm784_vm3 = vweird.f32 %v1585_v8 }
 0x141   :  { %1420 = vrot.lane.b32.xlu1 %v1257_v49, %s1534_s2  ;;  %1437 = vst [vmem:[#allocation2 + $0x18] sm:$0xff] %v640_v50  ;;  %v753_v24 = vshrl.u32 %v2016_v31, %v751_v58  ;;  %v756_v43 = vadd.s32 127, %v755_v9 }
 0x143   :  { %v754_v22 = vor.u32 %v753_v24, %v752_v3  ;;  %v757_v10 = vshll.u32 %v756_v43, 23 }
 0x145   :  { %v758_v61 = vor.u32 4788187, %v757_v10  ;;  %v761_v14 = vcvt.s32.f32 %v754_v22 }
 0x147   :  { %v759_v52 = vand.u32 2147483647, %v758_v61 }
 0x149   :  { %v762_v13 = vmul.f32 %v761_v14, %v759_v52 }
 0x14b   :  { %v763_v55 = vxor.u32 2147483648, %v762_v13 }
 0x14d   :  { %v764_v54 = vsel %vm643_vm14, %v763_v55, %v762_v13 }
 0x14e   :  { %v767_v30 = vsel %vm642_vm0, %v1585_v8, %v764_v54 }
 0x14f   :  { %v769_v40 = vmul.f32 %v767_v30, %v767_v30 }
 0x151   :  { %v770_v31 = vmul.f32 -0.001358992, %v769_v40  ;;  %v777_v41 = vmul.f32 -0.00019511016, %v769_v40 }
 0x153   :  { %v771_v47 = vadd.f32 0.041655596, %v770_v31  ;;  %v778_v57 = vadd.f32 0.008332121, %v777_v41 }
 0x155   :  { %v772_v37 = vmul.f32 %v771_v47, %v769_v40  ;;  %v779_v62 = vmul.f32 %v778_v57, %v769_v40 }
 0x157   :  { %v773_v4 = vadd.f32 -0.4999988, %v772_v37  ;;  %v780_v23 = vadd.f32 -0.16666654, %v779_v62 }
 0x159   :  { %v774_v35 = vmul.f32 %v773_v4, %v769_v40  ;;  %v781_v21 = vmul.f32 %v780_v23, %v769_v40 }
 0x15b   :  { %v775_v42 = vadd.f32 1.0, %v774_v35  ;;  %v782_v6 = vadd.f32 1.0, %v781_v21 }
 0x15d   :  { %v783_v26 = vmul.f32 %v782_v6, %v767_v30  ;;  %v792_v28 = vxor.u32 2147483648, %v775_v42 }
 0x15f   :  { %v789_v53 = vxor.u32 2147483648, %v783_v26  ;;  %v793_v1 = vsel %vm791_vm1, %v792_v28, %v783_v26  ;;  %v1409_v34 = vsel %vm1407_vm4, %v792_v28, %v783_v26 }
 0x161   :  { %v790_v44 = vsel %vm788_vm15, %v775_v42, %v789_v53  ;;  %v1406_v60 = vsel %vm1404_vm5, %v775_v42, %v789_v53 }
 0x162   :  { %v794_v29 = vsel %vm787_vm6, %v790_v44, %v793_v1  ;;  %v1410_v36 = vsel %vm1403_vm2, %v1406_v60, %v1409_v34 }
 0x163   :  { %v795_v25 = vsel %vm784_vm3, nan, %v794_v29  ;;  %v1411_v33 = vsel %vm784_vm3, nan, %v1410_v36 }
 0x164   :  { %1422 = vrot.lane.b32.xlu1 %v1411_v33, %s1534_s2 }
 0x177   :  { %v1417_v12 = vpop.permute.xlu0 %1416 }
 0x178   :  { %v1431_v16 = vsel %vm1424_vm7, %v1994_v51, %v1417_v12 }
 0x179   :  { %1434 = vst [vmem:[#allocation2 + $0x8] sm:$0xff] %v1431_v16 }
 0x18b   :  { %v1419_v7 = vpop.permute.xlu0 %1418 }
 0x18c   :  { %v1425_v48 = vsel %vm1424_vm7, %v1417_v12, %v1419_v7 }
 0x18d   :  { %1436 = vst.msk [vmem:[#allocation2 + $0x10] sm:$0xff] %vm1435_vm8, %v1425_v48 }
 0x1b3   :  { %v1421_v32 = vpop.permute.xlu1 %1420 }
 0x1b4   :  { %v1432_v8 = vsel %vm1424_vm7, %v795_v25, %v1421_v32 }
 0x1b5   :  { %1438 = vst [vmem:[#allocation2 + $0x20] sm:$0xff] %v1432_v8 }
 0x1d6   :  { %v1423_v27 = vpop.permute.xlu1 %1422 }
 0x1d7   :  { %v1426_v51 = vsel %vm1424_vm7, %v1421_v32, %v1423_v27 }
 0x1d8   :  { %1439 = vst.msk [vmem:[#allocation2 + $0x28] sm:$0xff] %vm1435_vm8, %v1426_v51 }
 0x1d9   :  { %1452 = dma.vmem_to_hbm [thread:$0]  %s1445_s19, 768, %s1447_s22, [#allocation3], %s1536_s23, %s1536_s23, %s1537_s24  }
 0x1da   :  { %1524 = dma.done.wait [#allocation3], 768  }
 0x1db   :  { %1525 = vsyncadd [#allocation3], 4294966528 }
 0x1dc   :  { %1457 = vsyncpa [#allocation3], 1 }

</bundles_post_ra>
